<compile_context>
chip_gen: v5e
topology: v5e:2x2
jax: 0.10.0
libtpu: 0.0.40
codegen_flags: <defaults>
</compile_context>

<pallas_src>
import jax
import jax.numpy as jnp
from jax import lax
from jax.experimental import pallas as pl
from jax.experimental.pallas import tpu as pltpu


def _repulsive_kernel(ab_ref, x_ref, r_ref, o_ref):
    # ab_ref: (2,) f32 scalars in SMEM -> [alpha, beta]
    alpha = ab_ref[0]
    beta = ab_ref[1]

    x = x_ref[...].astype(jnp.float32)              # (tile_m, D)  in-register upcast
    xsq = x * x                                     # VPU

    # Reduce over D on the MXU (idle in this kernel): ones(1,D) contracted with
    # xsq over D yields a lane-dense (1, tile_m) directly -- no full-tile XLU
    # transpose and no transposed f32 copy in VMEM.
    ones = jnp.ones((1, xsq.shape[1]), jnp.float32)
    sq = lax.dot_general(
        ones, xsq,
        dimension_numbers=(((1,), (1,)), ((), ())),
        precision=lax.Precision.HIGHEST,
        preferred_element_type=jnp.float32,
    )                                               # (1, tile_m), lane-dense
    nrm = jnp.sqrt(sq)                              # EUP

    r = r_ref[...].astype(jnp.float32)              # (1, tile_m)  lane-dense
    o_ref[...] = (alpha * jnp.exp(-beta * r) * nrm).astype(o_ref.dtype)


def _vmem_budget_and_limit():
    """Per-generation VMEM working-set budget and explicit scoped limit."""
    cap = 128 * 1024 * 1024
    try:
        info = pltpu.get_tpu_info()
        cap = int(getattr(info, "vmem_capacity_bytes", cap)) or cap
    except Exception:
        pass
    # Leave headroom for compiler-internal scratch; v7x (64 MiB/TC) -> ~48 MiB,
    # v5e/v6e (128 MiB) -> 100 MiB.
    budget = min(cap - 16 * 1024 * 1024, 100 * 1024 * 1024)
    budget = max(budget, 8 * 1024 * 1024)
    limit = min(cap, budget + 16 * 1024 * 1024)
    return budget, int(limit)


def _pick_tile_m(d, itemsize, budget):
    """Largest multiple-of-128 row tile whose pipeline working set fits budget."""
    d_pad = max(d, 128)                  # minor dim is lane-padded to 128 in VMEM
    bytes_per_row = (
        2 * d_pad * itemsize             # double-buffered input tile (padded lanes)
        + 2 * d_pad * 4                  # in-kernel f32 upcast + squared temporary
        + 4 * 4                          # double-buffered lane-dense r + out (f32)
    )
    t = (budget // bytes_per_row) // 128 * 128
    return max(int(t), 128)


def physics_informed_repulsive(encoded_features, r, alpha, beta):
    """encoded_features: (..., D); r broadcastable to (...,). Returns (...,) f32."""
    lead_shape = encoded_features.shape[:-1]
    d = encoded_features.shape[-1]
    m = 1
    for s in lead_shape:
        m *= s

    # Row-major flatten only; keep native dtype (wrapper-side upcast would
    # double HBM read bytes on a bandwidth-bound op).
    x2d = encoded_features.reshape(m, d)

    # Avoid materializing an HBM broadcast when r already has the leading shape.
    if r.shape == lead_shape:
        r2d = r.reshape(1, m)
    else:
        # TODO(synk): scalar / per-batch r could be passed via SMEM instead of a
        # materialized broadcast; uncommon for this module, so keep it simple.
        r2d = jnp.broadcast_to(r, lead_shape).reshape(1, m)

    ab = jnp.asarray([alpha, beta], dtype=jnp.float32)

    itemsize = jnp.dtype(x2d.dtype).itemsize
    budget, vmem_limit = _vmem_budget_and_limit()

    if m <= 128:
        tile_m = m                        # single block == full array dims (legal)
    else:
        tile_m = _pick_tile_m(d, itemsize, budget)
        # Keep >= ~8 grid steps when m allows so both v7x TensorCores get work
        # and the DMA pipeline has depth; tiles stay multiples of 128 (lane-dense).
        steps_cap = ((-(-m // 8)) + 127) // 128 * 128
        tile_m = max(128, min(tile_m, steps_cap))

    grid = (pl.cdiv(m, tile_m),)

    cost = pl.CostEstimate(
        flops=3 * m * d,                           # squares + reduce + scale
        transcendentals=2 * m,                     # exp + sqrt per output element
        bytes_accessed=m * d * itemsize + 8 * m,   # features + r read + out write
    )

    out = pl.pallas_call(
        _repulsive_kernel,
        out_shape=jax.ShapeDtypeStruct((1, m), jnp.float32),
        grid=grid,
        in_specs=[
            pl.BlockSpec(memory_space=pltpu.MemorySpace.SMEM),   # [alpha, beta]
            pl.BlockSpec((tile_m, d), lambda i: (i, 0)),         # feature rows
            pl.BlockSpec((1, tile_m), lambda i: (0, i)),         # r, lane-dense
        ],
        out_specs=pl.BlockSpec((1, tile_m), lambda i: (0, i)),   # lane-dense out
        compiler_params=pltpu.CompilerParams(
            dimension_semantics=("parallel",),   # shard row tiles over v7x TCs
            vmem_limit_bytes=vmem_limit,
        ),
        cost_estimate=cost,
    )(ab, x2d, r2d)

    return out.reshape(lead_shape)


if __name__ == "__main__":
    key = jax.random.PRNGKey(0)
    k1, k2 = jax.random.split(key)

    B, N, D = 2, 8, 32
    encoded_features = jax.random.normal(k1, (B, N, D), dtype=jnp.float32)
    r = jax.random.uniform(k2, (B, N), dtype=jnp.float32) * 2.0

    # nn.Parameter(torch.tensor(1.0)) for both alpha and beta
    alpha = 1.0
    beta = 1.0

    out = physics_informed_repulsive(encoded_features, r, alpha, beta)
    out = jax.block_until_ready(out)

    # reference check in plain JAX
    ref = alpha * jnp.exp(-beta * r) * jnp.linalg.norm(encoded_features, axis=-1)
    assert out.shape == (B, N)
    assert jnp.allclose(out, ref, atol=1e-4, rtol=1e-4)

    print("KERNEL_OK")
</pallas_src>

<mosaic_0001>
module attributes {stable_mosaic.version = 11 : i64} {
  func.func @_repulsive_kernel(%arg0: i32, %arg1: memref<2xf32, #tpu.memory_space<smem>>, %arg2: memref<16x32xf32, #tpu.memory_space<vmem>>, %arg3: memref<1x16xf32, #tpu.memory_space<vmem>>, %arg4: memref<1x16xf32, #tpu.memory_space<vmem>>) attributes {dimension_semantics = [#tpu.dimension_semantics<parallel>], iteration_bounds = array<i64: 1>, scalar_prefetch = 0 : i64, scratch_operands = 0 : i64, tpu.core_type = #tpu.core_type<tc>, window_params = [{transform_indices = @transform_0, window_bounds = array<i64: 2>}, {transform_indices = @transform_1, window_bounds = array<i64: 16, 32>}, {transform_indices = @transform_2, window_bounds = array<i64: 1, 16>}, {transform_indices = @transform_3, window_bounds = array<i64: 1, 16>}]} {
    %c0 = arith.constant 0 : index
    %0 = memref.load %arg1[%c0] : memref<2xf32, #tpu.memory_space<smem>>
    %c1 = arith.constant 1 : index
    %1 = memref.load %arg1[%c1] : memref<2xf32, #tpu.memory_space<smem>>
    %c0_0 = arith.constant 0 : index
    %c0_1 = arith.constant 0 : index
    %2 = vector.load %arg2[%c0_0, %c0_1] : memref<16x32xf32, #tpu.memory_space<vmem>>, vector<16x32xf32>
    %3 = arith.mulf %2, %2 : vector<16x32xf32>
    %cst = arith.constant 1.000000e+00 : f32
    %4 = vector.broadcast %cst : f32 to vector<1x32xf32>
    %cst_2 = arith.constant dense<0.000000e+00> : vector<1x16xf32>
    %5 = tpu.matmul %4, %3, %cst_2 {dimension_numbers = #tpu.dot_dimension_numbers<[1], [1], [0], [0], [0, 0, 1, 0], [], []>, precision = #tpu.contract_precision<fp32>} : vector<1x32xf32>, vector<16x32xf32>, vector<1x16xf32> -> vector<1x16xf32>
    %6 = math.sqrt %5 : vector<1x16xf32>
    %c0_3 = arith.constant 0 : index
    %c0_4 = arith.constant 0 : index
    %7 = vector.load %arg3[%c0_3, %c0_4] : memref<1x16xf32, #tpu.memory_space<vmem>>, vector<1x16xf32>
    %cst_5 = arith.constant 0.000000e+00 : f32
    %8 = arith.subf %cst_5, %1 : f32
    %9 = vector.broadcast %8 : f32 to vector<1x16xf32>
    %10 = arith.mulf %9, %7 : vector<1x16xf32>
    %11 = math.exp %10 : vector<1x16xf32>
    %12 = vector.broadcast %0 : f32 to vector<1x16xf32>
    %13 = arith.mulf %12, %11 : vector<1x16xf32>
    %14 = arith.mulf %13, %6 : vector<1x16xf32>
    %c0_6 = arith.constant 0 : index
    %c0_7 = arith.constant 0 : index
    %15 = vector.load %arg4[%c0_6, %c0_7] : memref<1x16xf32, #tpu.memory_space<vmem>>, vector<1x16xf32>
    tpu.vector_store %arg4[%c0_6, %c0_7], %14 {strides = array<i32>} : memref<1x16xf32, #tpu.memory_space<vmem>>, vector<1x16xf32>,
    return
  }
  func.func @transform_0(%arg0: i32) -> i32 {
    %c0_i32 = arith.constant 0 : i32
    %c0_i32_0 = arith.constant 0 : i32
    return %c0_i32 : i32
  }
  func.func @transform_1(%arg0: i32) -> (i32, i32) {
    %c0_i32 = arith.constant 0 : i32
    %c0_i32_0 = arith.constant 0 : i32
    return %arg0, %c0_i32 : i32, i32
  }
  func.func @transform_2(%arg0: i32) -> (i32, i32) {
    %c0_i32 = arith.constant 0 : i32
    %c0_i32_0 = arith.constant 0 : i32
    return %c0_i32, %arg0 : i32, i32
  }
  func.func @transform_3(%arg0: i32) -> (i32, i32) {
    %c0_i32 = arith.constant 0 : i32
    %c0_i32_0 = arith.constant 0 : i32
    return %c0_i32, %arg0 : i32, i32
  }
}

</mosaic_0001>

<bundles_post_ra>
// kernel: tpu_custom_call.1
= control target key start
LH: loop header
LB: loop body
LE: loop exit
PB: predicated region body
PF: predicated region fallthrough
CT: control target
= control target key end

     0   :  { %8 = vsyncpa [#allocation5], 0  ;;  %s386_s0 = inlined_call_operand.hbm [shape: f32[2], index: 0, kind: input, shape index: {}]   ;;  %s387_s1 = inlined_call_operand.hbm [shape: f32[16,32], index: 1, kind: input, shape index: {}]   ;;  %s388_s2 = inlined_call_operand.vmem [shape: f32[1,16], index: 2, kind: input, shape index: {}]   ;;  %s389_s3 = inlined_call_operand.hbm [shape: f32[1,16], index: 3, kind: output, shape index: {}]  }
   0x1   :  { %9 = vsyncpa [#allocation3], 0 }
   0x2   :  { %10 = vsyncpa [#allocation4], 0  ;;  %s16_s14 = sshll.u32 %s386_s0, 4  ;;  %s24_s17 = sshll.u32 %s387_s1, 4  ;;  %s17_s14 = int_to_ptr.hbm [resolvable:$true] %s16_s14  ;;  %s25_s17 = int_to_ptr.hbm [resolvable:$true] %s24_s17 }
   0x3   :  { %s341_s18 = smov [#allocation2]   ;;  %s342_s19 = smov [#allocation6]  }
   0x4   :  { %19 = dma.hbm_to_smem %s17_s14, 16, %s341_s18, [#allocation5]  }
   0x5   :  { %s26_s20 = sshll.u32 %s342_s19, 4  ;;  %s343_s21 = smov 128   ;;  %s27_s20 = int_to_ptr.vmem [resolvable:$true] %s26_s20 }
   0x6   :  { %s344_s22 = smov 8  }
   0x7   :  { %32 = dma.hbm_to_vmem [thread:$0]  %s25_s17, 256, %s27_s20, [#allocation3], %s343_s21, %s343_s21, %s344_s22  }
   0x8   :  { %335 = dma.done.wait [#allocation5], 16  }
   0x9   :  { %336 = vsyncadd [#allocation5], 4294967280 }
   0xa   :  { %337 = dma.done.wait [#allocation3], 256  }
   0xb   :  { %338 = vsyncadd [#allocation3], 4294967040 }
   0xc   :  { %43 = sfence }
   0xd   :  { %v47_v0 = vld [vmem:[#allocation6 + $0x8] sm:$0xff]  ;;  %vm50_vm0 = vcmask 261120   ;;  %v46_v1 = vld [vmem:[#allocation6] sm:$0xff]  ;;  %v345_v4 = vmov 0   ;;  %v346_v22 = vmov 1.0   ;;  %s260_s0 = sld [smem:[#allocation2 + $0x1]] }
   0xe   :  { %v49_v2 = vmul.f32 %v47_v0, %v47_v0  ;;  %v48_v3 = vmul.f32 %v46_v1, %v46_v1  ;;  %v52_v5 = vsel %vm50_vm0, 1.0, %v345_v4  ;;  %v231_v33 = vld [vmem:[%s388_s2] sm:$0x1]  ;;  %s44_s25 = sld [smem:[#allocation2]]  ;;  %s347_s2 = smov [#allocation7]   ;;  %vm240_vm3 = vcmask 122880  }
   0xf   :  { %v79_v6 = vsub.f32 %v52_v5, %v52_v5  ;;  %s247_s26 = sshll.u32 %s347_s2, 4  ;;  %s249_s29 = sshll.u32 %s389_s3, 4  ;;  %s248_s26 = int_to_ptr.vmem [resolvable:$true] %s247_s26  ;;  %s250_s29 = int_to_ptr.hbm [resolvable:$true] %s249_s29 }
  0x10   :  { %v58_v7 = vsel %vm50_vm0, %v49_v2, 0  ;;  %v55_v8 = vsel %vm50_vm0, %v48_v3, 0 }
  0x11   :  { %v74_v9 = vand.u32 4294901760, %v58_v7  ;;  %v76_v10 = vand.u32 4294901760, %v55_v8  ;;  %v80_v11 = vand.u32 4294901760, %v79_v6 }
  0x13   :  { %v102_v12 = vsub.f32 %v58_v7, %v74_v9  ;;  %75 = vmatpush.xpose.msra.mxu0 %v74_v9  ;;  %159 = vmatpush.xpose.msra.mxu3 %v74_v9  ;;  %v108_v13 = vsub.f32 %v55_v8, %v76_v10  ;;  %v81_v14 = vsub.f32 %v79_v6, %v80_v11  ;;  %s232_s1 = ssub.f32 0.0, %s260_s0 }
  0x14   :  { %v237_v44 = vstv %s44_s25 }
  0x15   :  { %134 = vmatpush.xpose.msra.mxu2 %v102_v12  ;;  %v103_v15 = vand.u32 4294901760, %v102_v12  ;;  %v109_v16 = vand.u32 4294901760, %v108_v13  ;;  %v82_v17 = vand.u32 4294901760, %v81_v14  ;;  %v233_v34 = vstv %s232_s1 }
  0x16   :  { %v234_v36 = vmul.f32 %v233_v34, %v231_v33 }
  0x17   :  { %v104_v18 = vsub.f32 %v102_v12, %v103_v15  ;;  %77 = vmatpush.xpose.msra.mxu0 %v76_v10  ;;  %161 = vmatpush.xpose.msra.mxu3 %v76_v10  ;;  %v110_v19 = vsub.f32 %v108_v13, %v109_v16 }
  0x18   :  { %v235_v37 = vmul.f32 1.442695, %v234_v36 }
  0x19   :  { %v105_v20 = vand.u32 4294901760, %v104_v18  ;;  %137 = vmatpush.xpose.msra.mxu2 %v108_v13  ;;  %v111_v21 = vand.u32 4294901760, %v110_v19 }
  0x1a   :  { %83 = vmatmul.f32.vlgmr.msra.gmra.mxu0 %v82_v17  ;;  %165 = vmatmul.f32.vlgmr.msra.gmra.mxu3 %v80_v11 }
  0x1b   :  { %186 = vmatpush.xpose.msrb.mxu0 %v103_v15  ;;  %106 = vmatpush.xpose.msra.mxu1 %v105_v20 }
  0x1c   :  { %140 = vmatmul.f32.vlgmr.msra.gmra.mxu2 %v79_v6 }
  0x1f   :  { %190 = vmatpush.xpose.msrb.mxu0 %v109_v16  ;;  %112 = vmatpush.xpose.msra.mxu1 %v111_v21 }
  0x22   :  { %261 = vmatmul.msk.f32.vlgmr.msra.gmra.mxu1 %vm50_vm0, %v346_v22  ;;  %262 = vmatmul.msk.f32.vlgmr.msrb.gmra.mxu0 %vm50_vm0, %v346_v22 }
  0x23   :  { %211 = vmatpush.xpose.msrb.mxu1 %v74_v9 }
  0x27   :  { %213 = vmatpush.xpose.msrb.mxu1 %v76_v10 }
  0x2a   :  { %263 = vmatmul.msk.f32.vlgmr.msrb.gmra.mxu1 %vm50_vm0, %v346_v22 }
  0x97   :  { %v84_v23 = vpop.f32.mrf.mxu0 }
  0x9d   :  { %v166_v27 = vpop.f32.mrf.mxu3 }
  0x9f   :  { %v115_v24 = vpop.f32.mrf.mxu1  ;;  %v141_v25 = vpop.f32.mrf.mxu2 }
  0xa0   :  { %v116_v26 = vadd.f32 %v115_v24, %v84_v23  ;;  %v193_v29 = vpop.f32.mrf.mxu0 }
  0xa2   :  { %v142_v28 = vadd.f32 %v141_v25, %v116_v26 }
  0xa4   :  { %v167_v30 = vadd.f32 %v166_v27, %v142_v28 }
  0xa6   :  { %v194_v31 = vadd.f32 %v193_v29, %v167_v30 }
  0xa7   :  { %v216_v32 = vpop.f32.mrf.mxu1 }
  0xa8   :  { %v217_v35 = vadd.f32 %v216_v32, %v194_v31 }
  0xaa   :  { %271 = vrsqrt.f32 %v217_v35  ;;  %vm226_vm1 = vcmp.eq.f32.partialorder %v217_v35, inf  ;;  %v229_v48 = vand.u32 2147483648, %v217_v35  ;;  %vm228_vm2 = vcmp.eq.f32.partialorder %v217_v35, 0.0 }
  0xab   :  { %273 = vpow2.f32 %v235_v37 }
  0xb0   :  { %v272_v38 = vpop.eup %271 }
  0xb1   :  { %v220_v39 = vmul.f32 %v272_v38, %v217_v35  ;;  %v274_v43 = vpop.eup %273 }
  0xb2   :  { %v238_v47 = vmul.f32 %v274_v43, %v237_v44 }
  0xb3   :  { %v221_v40 = vmul.f32 %v272_v38, %v220_v39 }
  0xb5   :  { %v222_v41 = vmul.f32 0.5, %v221_v40 }
  0xb7   :  { %v223_v42 = vsub.f32 1.5, %v222_v41 }
  0xb9   :  { %v224_v45 = vmul.f32 %v272_v38, %v223_v42 }
  0xbb   :  { %v225_v46 = vmul.f32 %v224_v45, %v217_v35 }
  0xbd   :  { %v227_v49 = vsel %vm226_vm1, %v217_v35, %v225_v46 }
  0xbe   :  { %v230_v50 = vsel %vm228_vm2, %v229_v48, %v227_v49 }
  0xbf   :  { %v239_v51 = vmul.f32 %v238_v47, %v230_v50 }
  0xc1   :  { %241 = vst.msk [vmem:[#allocation7] sm:$0x1] %vm240_vm3, %v239_v51 }
  0xc2   :  { %252 = dma.vmem_to_hbm [thread:$0]  %s248_s26, 16, %s250_s29, [#allocation4]  }
  0xc3   :  { %339 = dma.done.wait [#allocation4], 16  }
  0xc4   :  { %340 = vsyncadd [#allocation4], 4294967280 }
  0xc5   :  { %257 = vsyncpa [#allocation3], 1 }
  0xc6   :  { %258 = vsyncpa [#allocation4], 1 }
  0xc7   :  { %259 = vsyncpa [#allocation5], 1 }

</bundles_post_ra>
